<compile_context>
chip_gen: v7x
topology: tpu7x:2x2x1
jax: 0.10.0
libtpu: 0.0.40
codegen_flags: <defaults>
</compile_context>

<pallas_src>
import functools

import jax
import jax.numpy as jnp
from jax.experimental import pallas as pl
from jax.experimental.pallas import tpu as pltpu


def _round_up(a, b):
    return (a + b - 1) // b * b


def _pool_sum_kernel(x_ref, out_ref, acc_ref, *, hw, thw, mask_cols):
    """Row-wise partial sums of x over the H*W axis, accumulated across hw tiles.

    x_ref:   (TR, THW)  native dtype tile of the (N*C, H*W) view of x
    out_ref: (TR, 128)  f32 lane-parallel partial sums (reduced to scalar outside)
    acc_ref: (TR, 128)  f32 scratch accumulator, persists across the hw grid axis
    """
    hw_idx = pl.program_id(1)

    @pl.when(hw_idx == 0)
    def _():
        acc_ref[...] = jnp.zeros_like(acc_ref)

    x = x_ref[...].astype(jnp.float32)  # cast on the VMEM tile, not in the wrapper

    if mask_cols:
        # Last H*W tile is partial: zero out-of-range columns so the sum (and hence
        # the mean with the true H*W divisor) stays exact.
        col = jax.lax.broadcasted_iota(jnp.int32, x.shape, 1) + hw_idx * thw
        x = jnp.where(col < hw, x, 0.0)

    # Lane-parallel accumulation: add the THW//128 lane-groups together on the VPU.
    # Slices are at 128-lane (vreg) boundaries, so this is pure elementwise adds;
    # the expensive cross-lane (XLU) reduction is deferred to the tiny epilogue.
    tr = x.shape[0]
    partial = jnp.zeros((tr, 128), jnp.float32)
    for g in range(thw // 128):
        partial = partial + x[:, g * 128:(g + 1) * 128]
    acc_ref[...] += partial

    @pl.when(hw_idx == pl.num_programs(1) - 1)
    def _():
        out_ref[...] = acc_ref[...]


def channel_att_forward(x, conv_w, bn_gamma, bn_beta, bn_mean, bn_var, eps=1e-5):
    """x: (N, C, H, W) NCHW.  Returns (x, atten) with atten of shape (N, Cout, 1, 1)."""
    N, C, H, W = x.shape
    Cout, Cin = conv_w.shape[0], conv_w.shape[1]
    HW = H * W
    NC = N * C

    # ---------------- Pallas: tiled global average pool (sum part) ----------------
    x_rows = x.reshape(NC, HW)  # free for contiguous NCHW; keep native dtype

    TR = min(256, _round_up(NC, 8))            # sublane-aligned row tile
    THW = min(1024, _round_up(HW, 128))        # lane-aligned H*W tile (512-1024 sweet spot)
    mask_cols = (HW % THW) != 0
    grid = (pl.cdiv(NC, TR), pl.cdiv(HW, THW))

    kernel = functools.partial(_pool_sum_kernel, hw=HW, thw=THW, mask_cols=mask_cols)

    cost = pl.CostEstimate(
        flops=int(NC * HW),
        transcendentals=0,
        bytes_accessed=int(NC * HW * x.dtype.itemsize + NC * 128 * 4),
    )

    partial_sums = pl.pallas_call(
        kernel,
        out_shape=jax.ShapeDtypeStruct((NC, 128), jnp.float32),
        grid_spec=pltpu.PrefetchScalarGridSpec(
            num_scalar_prefetch=0,
            grid=grid,
            in_specs=[pl.BlockSpec((TR, THW), lambda r, h: (r, h))],
            # Same output block across the hw axis -> stays resident; written once
            # in the finalize step (lane-dense 128-wide slab -> unmasked stores).
            out_specs=pl.BlockSpec((TR, 128), lambda r, h: (r, 0)),
            scratch_shapes=[pltpu.VMEM((TR, 128), jnp.float32)],
        ),
        compiler_params=pltpu.CompilerParams(
            dimension_semantics=("parallel", "arbitrary"),
        ),
        cost_estimate=cost,
    )(x_rows)

    # ---------------- JAX epilogue: 1x1 conv + folded BN (negligible flops) -------
    pooled_sum = jnp.sum(partial_sums, axis=-1).reshape(N, C)      # (N, C) spatial sums

    scale = bn_gamma / jnp.sqrt(bn_var + eps)                      # (Cout,)
    w2d = conv_w.reshape(Cout, Cin).astype(jnp.float32)            # squeeze 1x1 spatial
    # Fold the 1/(H*W) mean factor and the BN scale into the (transposed) weight.
    w_folded = (w2d * scale[:, None]).T / HW                       # (Cin, Cout)
    bias = bn_beta - bn_mean * scale                               # (Cout,)

    atten = pooled_sum @ w_folded + bias[None, :]                  # (N, Cout)
    atten = atten.reshape(N, Cout, 1, 1).astype(x.dtype)
    return x, atten


if __name__ == "__main__":
    key = jax.random.PRNGKey(0)
    k_x, k_w, k_g, k_b, k_m, k_v = jax.random.split(key, 6)

    N, C, H, W = 2, 4, 16, 16  # in_channels == out_channels == 4 for the 1x1 conv
    x = jax.random.normal(k_x, (N, C, H, W), dtype=jnp.float32)

    # ConvModule(out_channels, out_channels, 1) with norm -> conv has no bias.
    conv_w = jax.random.normal(k_w, (C, C, 1, 1), dtype=jnp.float32) * 0.1
    bn_gamma = jax.random.normal(k_g, (C,), dtype=jnp.float32) * 0.1 + 1.0
    bn_beta = jax.random.normal(k_b, (C,), dtype=jnp.float32) * 0.1
    bn_mean = jax.random.normal(k_m, (C,), dtype=jnp.float32) * 0.1
    bn_var = jax.nn.softplus(jax.random.normal(k_v, (C,), dtype=jnp.float32)) + 0.5

    x_out, atten = channel_att_forward(x, conv_w, bn_gamma, bn_beta, bn_mean, bn_var)
    jax.block_until_ready((x_out, atten))

    # Reference check in plain JAX (same math, eval-mode BN).
    pooled_ref = jnp.mean(x, axis=(2, 3), keepdims=True)                      # (N,C,1,1)
    conv_ref = jnp.einsum("nchw,oc->nohw", pooled_ref, conv_w.reshape(C, C))   # 1x1 conv
    scale_ref = bn_gamma / jnp.sqrt(bn_var + 1e-5)
    atten_ref = conv_ref * scale_ref.reshape(1, C, 1, 1) + (
        bn_beta - bn_mean * scale_ref
    ).reshape(1, C, 1, 1)

    assert x_out.shape == (N, C, H, W)
    assert atten.shape == (N, C, 1, 1)
    assert jnp.allclose(x_out, x)
    assert jnp.allclose(atten, atten_ref, atol=1e-5, rtol=1e-5)

    print("KERNEL_OK")
</pallas_src>

<mosaic_0001>
module attributes {stable_mosaic.version = 11 : i64} {
  func.func @_pool_sum_kernel(%arg0: i32, %arg1: i32, %arg2: memref<8x256xf32, #tpu.memory_space<vmem>>, %arg3: memref<8x128xf32, #tpu.memory_space<vmem>>, %arg4: memref<8x128xf32, #tpu.memory_space<vmem>>) attributes {dimension_semantics = [#tpu.dimension_semantics<parallel>, #tpu.dimension_semantics<arbitrary>], iteration_bounds = array<i64: 1, 1>, scalar_prefetch = 0 : i64, scratch_operands = 1 : i64, tpu.core_type = #tpu.core_type<tc>, window_params = [{transform_indices = @transform_0, window_bounds = array<i64: 8, 256>}, {transform_indices = @transform_1, window_bounds = array<i64: 8, 128>}]} {
    %c0_i32 = arith.constant 0 : i32
    %0 = arith.cmpi eq, %arg1, %c0_i32 : i32
    %1 = arith.extui %0 : i1 to i32
    %c0_i32_0 = arith.constant 0 : i32
    %2 = arith.cmpi ne, %1, %c0_i32_0 : i32
    scf.if %2 {
      %cst_8 = arith.constant 0.000000e+00 : f32
      %15 = vector.broadcast %cst_8 : f32 to vector<8x128xf32>
      %c0_9 = arith.constant 0 : index
      %c0_10 = arith.constant 0 : index
      %16 = vector.load %arg4[%c0_9, %c0_10] : memref<8x128xf32, #tpu.memory_space<vmem>>, vector<8x128xf32>
      tpu.vector_store %arg4[%c0_9, %c0_10], %15 {strides = array<i32>} : memref<8x128xf32, #tpu.memory_space<vmem>>, vector<8x128xf32>,
    } else {
    }
    %c0 = arith.constant 0 : index
    %c0_1 = arith.constant 0 : index
    %3 = vector.load %arg2[%c0, %c0_1] : memref<8x256xf32, #tpu.memory_space<vmem>>, vector<8x256xf32>
    %cst = arith.constant 0.000000e+00 : f32
    %4 = vector.broadcast %cst : f32 to vector<8x128xf32>
    %5 = vector.extract_strided_slice %3 {offsets = [0, 0], sizes = [8, 128], strides = [1, 1]} : vector<8x256xf32> to vector<8x128xf32>
    %6 = arith.addf %4, %5 : vector<8x128xf32>
    %7 = vector.extract_strided_slice %3 {offsets = [0, 128], sizes = [8, 128], strides = [1, 1]} : vector<8x256xf32> to vector<8x128xf32>
    %8 = arith.addf %6, %7 : vector<8x128xf32>
    %c0_2 = arith.constant 0 : index
    %c0_3 = arith.constant 0 : index
    %9 = vector.load %arg4[%c0_2, %c0_3] : memref<8x128xf32, #tpu.memory_space<vmem>>, vector<8x128xf32>
    %10 = arith.addf %9, %8 : vector<8x128xf32>
    %c0_4 = arith.constant 0 : index
    %c0_5 = arith.constant 0 : index
    %11 = vector.load %arg4[%c0_4, %c0_5] : memref<8x128xf32, #tpu.memory_space<vmem>>, vector<8x128xf32>
    tpu.vector_store %arg4[%c0_4, %c0_5], %10 {strides = array<i32>} : memref<8x128xf32, #tpu.memory_space<vmem>>, vector<8x128xf32>,
    %c0_i32_6 = arith.constant 0 : i32
    %12 = arith.cmpi eq, %arg1, %c0_i32_6 : i32
    %13 = arith.extui %12 : i1 to i32
    %c0_i32_7 = arith.constant 0 : i32
    %14 = arith.cmpi ne, %13, %c0_i32_7 : i32
    scf.if %14 {
      %c0_8 = arith.constant 0 : index
      %c0_9 = arith.constant 0 : index
      %15 = vector.load %arg4[%c0_8, %c0_9] : memref<8x128xf32, #tpu.memory_space<vmem>>, vector<8x128xf32>
      %c0_10 = arith.constant 0 : index
      %c0_11 = arith.constant 0 : index
      %16 = vector.load %arg3[%c0_10, %c0_11] : memref<8x128xf32, #tpu.memory_space<vmem>>, vector<8x128xf32>
      tpu.vector_store %arg3[%c0_10, %c0_11], %15 {strides = array<i32>} : memref<8x128xf32, #tpu.memory_space<vmem>>, vector<8x128xf32>,
    } else {
    }
    return
  }
  func.func @transform_0(%arg0: i32, %arg1: i32) -> (i32, i32) {
    %c0_i32 = arith.constant 0 : i32
    return %arg0, %arg1 : i32, i32
  }
  func.func @transform_1(%arg0: i32, %arg1: i32) -> (i32, i32) {
    %c0_i32 = arith.constant 0 : i32
    %c0_i32_0 = arith.constant 0 : i32
    return %arg0, %c0_i32 : i32, i32
  }
}

</mosaic_0001>

<bundles_post_ra>
// kernel: tpu_custom_call.1
= control target key start
LH: loop header
LB: loop body
LE: loop exit
PB: predicated region body
PF: predicated region fallthrough
CT: control target
= control target key end

     0   :  { %6 = vsyncpa [#allocation4], 0  ;;  %s139_s0 = inlined_call_operand.hbm [shape: f32[8,256], index: 0, kind: input, shape index: {}]   ;;  %s140_s1 = inlined_call_operand.hbm [shape: f32[8,128], index: 1, kind: output, shape index: {}]  }
   0x1   :  { %7 = vsyncpa [#allocation5], 0  ;;  %s103_s6 = smov [#allocation3]   ;;  %s55_s10 = scalar_lea.hbm %s139_s0, 256 }
   0x2   :  { %s14_s7 = sshll.u32 %s103_s6, 4  ;;  %p56_p0 = scmp.ne.s32.totalorder %s139_s0, %s55_s10  ;;  %s15_s7 = int_to_ptr.vmem [resolvable:$true] %s14_s7 }
   0x3   :  { %p59_p1 = scmp.lt.u32.totalorder %s55_s10, %s139_s0 }
   0x5   :  { %p61_p2 = pnand %p59_p1, %p56_p0 }
   0x7   :  { %64 = shalt.err (!%p61_p2)
}
   0x8   :  { %s65_s15 = scalar_lea.vmem %s15_s7, 256  ;;  %p70_p4 = scmp.lt.s32.totalorder %s15_s7, %s15_s7 }
   0x9   :  { %p66_p3 = scmp.ne.s32.totalorder %s15_s7, %s65_s15  ;;  %p71_p5 = scmp.lt.s32.totalorder %s65_s15, %s65_s15 }
   0xb   :  { %p72_p6 = por %p71_p5, %p70_p4 }
   0xd   :  { %p73_p7 = pnand %p72_p6, %p66_p3 }
   0xf   :  { %76 = shalt.err (!%p73_p7)
}
  0x10   :  { %17 = dma.hbm_to_vmem [thread:$0]  %s139_s0, 256, %s15_s7, [#allocation4]  }
  0x11   :  { %99 = dma.done.wait [#allocation4], 256  }
  0x12   :  { %100 = vsyncadd [#allocation4], 4294967040  ;;  %s104_s18 = smov [#allocation6]   ;;  %v26_v0 = vld [vmem:[#allocation3] sm:$0xff]  ;;  %v27_v1 = vld [vmem:[#allocation3 + $0x8] sm:$0xff] }
  0x13   :  { %s44_s19 = sshll.u32 %s104_s18, 4  ;;  %v29_v2 = vadd.f32 %v27_v1, %v26_v0  ;;  %s45_s19 = int_to_ptr.vmem [resolvable:$true] %s44_s19 }
  0x14   :  { %s77_s20 = scalar_lea.vmem %s45_s19, 128  ;;  %p82_p9 = scmp.lt.s32.totalorder %s45_s19, %s45_s19 }
  0x15   :  { %37 = vst [vmem:[#allocation6] sm:$0xff] %v29_v2  ;;  %p78_p8 = scmp.ne.s32.totalorder %s45_s19, %s77_s20  ;;  %p83_p10 = scmp.lt.s32.totalorder %s77_s20, %s77_s20 }
  0x17   :  { %p84_p11 = por %p83_p10, %p82_p9 }
  0x19   :  { %p85_p12 = pnand %p84_p11, %p78_p8 }
  0x1b   :  { %88 = shalt.err (!%p85_p12)
}
  0x1c   :  { %s89_s0 = scalar_lea.hbm %s140_s1, 128 }
  0x1d   :  { %p90_p13 = scmp.ne.s32.totalorder %s140_s1, %s89_s0  ;;  %p93_p0 = scmp.lt.u32.totalorder %s89_s0, %s140_s1 }
  0x1f   :  { %p95_p1 = pnand %p93_p0, %p90_p13 }
  0x21   :  { %98 = shalt.err (!%p95_p1)
}
  0x22   :  { %47 = dma.vmem_to_hbm [thread:$0]  %s45_s19, 128, %s140_s1, [#allocation5]  }
  0x23   :  { %101 = dma.done.wait [#allocation5], 128  }
  0x24   :  { %102 = vsyncadd [#allocation5], 4294967168 }
  0x25   :  { %51 = vsyncpa [#allocation4], 1 }
  0x26   :  { %52 = vsyncpa [#allocation5], 1 }

</bundles_post_ra>
